<compile_context>
chip_gen: v7x
topology: tpu7x:2x2x1
jax: 0.10.0
libtpu: 0.0.40
codegen_flags: <defaults>
</compile_context>

<pallas_src>
import functools

import numpy as np
import jax
import jax.numpy as jnp
from jax import lax
from jax.experimental import pallas as pl
from jax.experimental.pallas import tpu as pltpu


def prepare_mid_params(w1, b1, w2, b2, Wp):
    """One-time (parameter-load time) weight/bias rearrangement.

    Each 3x3 conv (O, I, 3, 3) is expanded, per kernel-row dy, into a
    block-banded matrix G[dy] of shape ((Wp+2)*I, Wp*O) such that a matmul of
    the zero-padded, width-folded activation row  pad[b, h+dy, :]  with G[dy]
    produces the conv output row in folded (w, o) lane layout:

        G[dy][(w+dx)*I + c, w*O + o] = W[o, c, dy, dx]
    """
    def expand(w, b):
        w = np.asarray(w, dtype=np.float32)          # (O, I, 3, 3)
        b = np.asarray(b, dtype=np.float32)          # (O,)
        O, I = w.shape[0], w.shape[1]
        K0, N = (Wp + 2) * I, Wp * O
        g = np.zeros((3, K0, N), np.float32)
        for dy in range(3):
            for dx in range(3):
                blk = w[:, :, dy, dx].T              # (I, O)
                for wc in range(Wp):
                    g[dy, (wc + dx) * I:(wc + dx + 1) * I,
                          wc * O:(wc + 1) * O] = blk
        bt = np.tile(b, Wp).reshape(1, N)            # bt[0, w*O + o] = b[o]
        return jnp.asarray(g, jnp.bfloat16), jnp.asarray(bt, jnp.float32)

    g1, b1t = expand(w1, b1)
    g2, b2t = expand(w2, b2)
    return g1, b1t, g2, b2t


def mid_forward(x, g1, b1t, g2, b2t):
    """Forward pass of `mid`.

    x : (B, Cin, H, W) float32 NCHW (PyTorch convention).
    g1/b1t/g2/b2t : pre-expanded parameters from prepare_mid_params.
    returns (B, Cout, H//2, W//2) NCHW.
    """
    B, Cin, H, W = x.shape
    # TODO(synk): odd H/W (MaxPool2d floor behaviour) not handled; module is used with even sizes.
    assert H % 2 == 0 and W % 2 == 0, "MaxPool2d(2) path assumes even H, W"
    Hp, Wp = H // 2, W // 2
    M = B * Hp
    Cmid = g1.shape[2] // Wp
    Cout = g2.shape[2] // Wp
    L1, L2 = (Wp + 2) * Cin, (Wp + 2) * Cmid
    N1, N2 = Wp * Cmid, Wp * Cout
    assert g1.shape == (3, L1, N1) and g2.shape == (3, L2, N2)

    def kernel(x_ref, g1_ref, b1_ref, g2_ref, b2_ref, o_ref, pad1_ref, pad2_ref):
        # x_ref : (2, 2, B*Hp, Wp*Cin) f32 — the four 2x2-pool taps, lane-folded
        # g*_ref: (3, (Wp+2)*C, Wp*O) bf16 — per-dy expanded conv weights
        # b*_ref: (1, Wp*O) f32
        # o_ref : (B*Hp, Wp*Cout) f32 (lane-dense output)
        # pad*_ref: (B, Hp+2, (Wp+2)*C) f32 scratch (zero-halo padded activations)

        # ---- MaxPool2d(2): elementwise max of the four pool-window taps ------
        mp = jnp.maximum(jnp.maximum(x_ref[0, 0], x_ref[0, 1]),
                         jnp.maximum(x_ref[1, 0], x_ref[1, 1]))   # (M, Wp*Cin)

        def conv3x3(src, pad_ref, g_ref, b_ref, C, L, N):
            # src: (M, Wp*C) f32 value in folded (w, c) lane layout.
            # Zero only the 1-wide halo, then write the interior.
            pad_ref[:, 0:1, :] = jnp.zeros((B, 1, L), jnp.float32)
            pad_ref[:, Hp + 1:Hp + 2, :] = jnp.zeros((B, 1, L), jnp.float32)
            pad_ref[:, :, 0:C] = jnp.zeros((B, Hp + 2, C), jnp.float32)
            pad_ref[:, :, L - C:L] = jnp.zeros((B, Hp + 2, C), jnp.float32)
            pad_ref[:, 1:Hp + 1, C:(Wp + 1) * C] = src.reshape(B, Hp, Wp * C)

            acc = jnp.zeros((M, N), jnp.float32)
            for dy in range(3):            # 3 MXU pushes (bf16 in, f32 accumulate)
                slab = pad_ref[:, dy:dy + Hp, :].reshape(M, L).astype(jnp.bfloat16)
                acc = acc + jnp.dot(slab, g_ref[dy],
                                    preferred_element_type=jnp.float32)
            return acc + b_ref[...]

        h1 = conv3x3(mp, pad1_ref, g1_ref, b1_ref, Cin, L1, N1)     # (M, Wp*Cmid)
        out = conv3x3(h1, pad2_ref, g2_ref, b2_ref, Cmid, L2, N2)   # (M, Wp*Cout)
        o_ref[...] = out.astype(o_ref.dtype)

    # ---- input layout glue (plain JAX, fused by XLA under jit) --------------
    # NCHW -> pool-window taps with h folded into rows and (w, c) into lanes:
    #   x_win[p, q, b*Hp + h, w*Cin + c] = x[b, c, 2h+p, 2w+q]
    xt = jnp.transpose(x, (0, 2, 3, 1)).reshape(B, Hp, 2, Wp, 2, Cin)
    x_win = jnp.transpose(xt, (2, 4, 0, 1, 3, 5)).reshape(2, 2, M, Wp * Cin)

    flops = 2 * M * 3 * (L1 * N1 + L2 * N2)
    bytes_accessed = (x_win.size * 4 + g1.size * 2 + g2.size * 2
                      + b1t.size * 4 + b2t.size * 4 + M * N2 * 4)

    out2d = pl.pallas_call(
        kernel,
        out_shape=jax.ShapeDtypeStruct((M, N2), x.dtype),
        in_specs=[pl.BlockSpec(memory_space=pltpu.MemorySpace.VMEM)] * 5,
        out_specs=pl.BlockSpec(memory_space=pltpu.MemorySpace.VMEM),
        scratch_shapes=[
            pltpu.VMEM((B, Hp + 2, L1), jnp.float32),
            pltpu.VMEM((B, Hp + 2, L2), jnp.float32),
        ],
        cost_estimate=pl.CostEstimate(flops=flops, transcendentals=0,
                                      bytes_accessed=bytes_accessed),
    )(x_win, g1, b1t, g2, b2t)

    # back to PyTorch NCHW
    out = out2d.reshape(B, Hp, Wp, Cout)
    return jnp.transpose(out, (0, 3, 1, 2))


if __name__ == "__main__":
    key = jax.random.PRNGKey(0)
    kx, kw1, kb1, kw2, kb2 = jax.random.split(key, 5)

    # mid(in_ch=4, out_ch=8, small_ch=None) on a (2, 4, 16, 16) input.
    B, IN_CH, OUT_CH, H, W = 2, 4, 8, 16, 16

    x = jax.random.normal(kx, (B, IN_CH, H, W), dtype=jnp.float32)
    w1 = jax.random.normal(kw1, (OUT_CH, IN_CH, 3, 3), dtype=jnp.float32) * 0.1
    b1 = jax.random.normal(kb1, (OUT_CH,), dtype=jnp.float32) * 0.1
    w2 = jax.random.normal(kw2, (IN_CH, OUT_CH, 3, 3), dtype=jnp.float32) * 0.1  # small_ch=None
    b2 = jax.random.normal(kb2, (IN_CH,), dtype=jnp.float32) * 0.1

    # Parameter prep is hoisted out of the forward pass (done once, like load time).
    g1, b1t, g2, b2t = prepare_mid_params(w1, b1, w2, b2, Wp=W // 2)

    fwd = jax.jit(mid_forward)
    out = jax.block_until_ready(fwd(x, g1, b1t, g2, b2t))

    # Pure-JAX f32 reference (maxpool + two SAME-padded 3x3 convs).
    xp = x.reshape(B, IN_CH, H // 2, 2, W // 2, 2).max(axis=(3, 5))
    y = lax.conv_general_dilated(
        xp, w1, window_strides=(1, 1), padding=((1, 1), (1, 1)),
        dimension_numbers=("NCHW", "OIHW", "NCHW"),
        precision=lax.Precision.HIGHEST) + b1[None, :, None, None]
    ref = lax.conv_general_dilated(
        y, w2, window_strides=(1, 1), padding=((1, 1), (1, 1)),
        dimension_numbers=("NCHW", "OIHW", "NCHW"),
        precision=lax.Precision.HIGHEST) + b2[None, :, None, None]

    assert out.shape == (B, IN_CH, H // 2, W // 2)
    max_err = float(jnp.max(jnp.abs(out - ref)))
    # bf16 MXU operands with f32 accumulation -> tolerance loosened vs exact f32.
    assert jnp.allclose(out, ref, atol=3e-2, rtol=3e-2), f"max_err={max_err}"

    print("KERNEL_OK")
</pallas_src>

<mosaic_0001>
module attributes {stable_mosaic.version = 11 : i64} {
  func.func @kernel(%arg0: memref<2x2x16x32xf32, #tpu.memory_space<vmem>>, %arg1: memref<3x40x64xbf16, #tpu.memory_space<vmem>>, %arg2: memref<1x64xf32, #tpu.memory_space<vmem>>, %arg3: memref<3x80x32xbf16, #tpu.memory_space<vmem>>, %arg4: memref<1x32xf32, #tpu.memory_space<vmem>>, %arg5: memref<16x32xf32, #tpu.memory_space<vmem>>, %arg6: memref<2x10x40xf32, #tpu.memory_space<vmem>>, %arg7: memref<2x10x80xf32, #tpu.memory_space<vmem>>) attributes {dimension_semantics = [], scalar_prefetch = 0 : i64, scratch_operands = 2 : i64, tpu.core_type = #tpu.core_type<tc>} {
    %c0 = arith.constant 0 : index
    %c0_0 = arith.constant 0 : index
    %c0_1 = arith.constant 0 : index
    %c0_2 = arith.constant 0 : index
    %0 = vector.load %arg0[%c0, %c0_0, %c0_1, %c0_2] : memref<2x2x16x32xf32, #tpu.memory_space<vmem>>, vector<1x1x16x32xf32>
    %1 = vector.shape_cast %0 : vector<1x1x16x32xf32> to vector<16x32xf32>
    %c0_3 = arith.constant 0 : index
    %c1 = arith.constant 1 : index
    %c0_4 = arith.constant 0 : index
    %c0_5 = arith.constant 0 : index
    %2 = vector.load %arg0[%c0_3, %c1, %c0_4, %c0_5] : memref<2x2x16x32xf32, #tpu.memory_space<vmem>>, vector<1x1x16x32xf32>
    %3 = vector.shape_cast %2 : vector<1x1x16x32xf32> to vector<16x32xf32>
    %4 = arith.maximumf %1, %3 : vector<16x32xf32>
    %c1_6 = arith.constant 1 : index
    %c0_7 = arith.constant 0 : index
    %c0_8 = arith.constant 0 : index
    %c0_9 = arith.constant 0 : index
    %5 = vector.load %arg0[%c1_6, %c0_7, %c0_8, %c0_9] : memref<2x2x16x32xf32, #tpu.memory_space<vmem>>, vector<1x1x16x32xf32>
    %6 = vector.shape_cast %5 : vector<1x1x16x32xf32> to vector<16x32xf32>
    %c1_10 = arith.constant 1 : index
    %c1_11 = arith.constant 1 : index
    %c0_12 = arith.constant 0 : index
    %c0_13 = arith.constant 0 : index
    %7 = vector.load %arg0[%c1_10, %c1_11, %c0_12, %c0_13] : memref<2x2x16x32xf32, #tpu.memory_space<vmem>>, vector<1x1x16x32xf32>
    %8 = vector.shape_cast %7 : vector<1x1x16x32xf32> to vector<16x32xf32>
    %9 = arith.maximumf %6, %8 : vector<16x32xf32>
    %10 = arith.maximumf %4, %9 : vector<16x32xf32>
    %cst = arith.constant 0.000000e+00 : f32
    %11 = vector.broadcast %cst : f32 to vector<2x1x40xf32>
    %c0_14 = arith.constant 0 : index
    %c0_15 = arith.constant 0 : index
    %c0_16 = arith.constant 0 : index
    %12 = vector.load %arg6[%c0_14, %c0_15, %c0_16] : memref<2x10x40xf32, #tpu.memory_space<vmem>>, vector<2x1x40xf32>
    tpu.vector_store %arg6[%c0_14, %c0_15, %c0_16], %11 {strides = array<i32>} : memref<2x10x40xf32, #tpu.memory_space<vmem>>, vector<2x1x40xf32>,
    %cst_17 = arith.constant 0.000000e+00 : f32
    %13 = vector.broadcast %cst_17 : f32 to vector<2x1x40xf32>
    %c0_18 = arith.constant 0 : index
    %c9 = arith.constant 9 : index
    %c0_19 = arith.constant 0 : index
    %14 = vector.load %arg6[%c0_18, %c9, %c0_19] : memref<2x10x40xf32, #tpu.memory_space<vmem>>, vector<2x1x40xf32>
    tpu.vector_store %arg6[%c0_18, %c9, %c0_19], %13 {strides = array<i32>} : memref<2x10x40xf32, #tpu.memory_space<vmem>>, vector<2x1x40xf32>,
    %cst_20 = arith.constant 0.000000e+00 : f32
    %15 = vector.broadcast %cst_20 : f32 to vector<2x10x4xf32>
    %c0_21 = arith.constant 0 : index
    %c0_22 = arith.constant 0 : index
    %c0_23 = arith.constant 0 : index
    %16 = vector.load %arg6[%c0_21, %c0_22, %c0_23] : memref<2x10x40xf32, #tpu.memory_space<vmem>>, vector<2x10x4xf32>
    tpu.vector_store %arg6[%c0_21, %c0_22, %c0_23], %15 {strides = array<i32>} : memref<2x10x40xf32, #tpu.memory_space<vmem>>, vector<2x10x4xf32>,
    %cst_24 = arith.constant 0.000000e+00 : f32
    %17 = vector.broadcast %cst_24 : f32 to vector<2x10x4xf32>
    %c0_25 = arith.constant 0 : index
    %c0_26 = arith.constant 0 : index
    %c36 = arith.constant 36 : index
    %18 = vector.load %arg6[%c0_25, %c0_26, %c36] : memref<2x10x40xf32, #tpu.memory_space<vmem>>, vector<2x10x4xf32>
    tpu.vector_store %arg6[%c0_25, %c0_26, %c36], %17 {strides = array<i32>} : memref<2x10x40xf32, #tpu.memory_space<vmem>>, vector<2x10x4xf32>,
    %19 = vector.shape_cast %10 : vector<16x32xf32> to vector<2x8x32xf32>
    %c0_27 = arith.constant 0 : index
    %c1_28 = arith.constant 1 : index
    %c4 = arith.constant 4 : index
    %20 = vector.load %arg6[%c0_27, %c1_28, %c4] : memref<2x10x40xf32, #tpu.memory_space<vmem>>, vector<2x8x32xf32>
    tpu.vector_store %arg6[%c0_27, %c1_28, %c4], %19 {strides = array<i32>} : memref<2x10x40xf32, #tpu.memory_space<vmem>>, vector<2x8x32xf32>,
    %cst_29 = arith.constant 0.000000e+00 : f32
    %21 = vector.broadcast %cst_29 : f32 to vector<16x64xf32>
    %c0_30 = arith.constant 0 : index
    %c0_31 = arith.constant 0 : index
    %c0_32 = arith.constant 0 : index
    %22 = vector.load %arg6[%c0_30, %c0_31, %c0_32] : memref<2x10x40xf32, #tpu.memory_space<vmem>>, vector<2x8x40xf32>
    %23 = vector.shape_cast %22 : vector<2x8x40xf32> to vector<16x40xf32>
    %24 = arith.truncf %23 : vector<16x40xf32> to vector<16x40xbf16>
    %c0_33 = arith.constant 0 : index
    %c0_34 = arith.constant 0 : index
    %c0_35 = arith.constant 0 : index
    %25 = vector.load %arg1[%c0_33, %c0_34, %c0_35] : memref<3x40x64xbf16, #tpu.memory_space<vmem>>, vector<1x40x64xbf16>
    %26 = vector.shape_cast %25 : vector<1x40x64xbf16> to vector<40x64xbf16>
    %cst_36 = arith.constant dense<0.000000e+00> : vector<16x64xf32>
    %27 = tpu.matmul %24, %26, %cst_36 {dimension_numbers = #tpu.dot_dimension_numbers<[1], [0], [0], [1], [0, 0, 1, 1], [], []>} : vector<16x40xbf16>, vector<40x64xbf16>, vector<16x64xf32> -> vector<16x64xf32>
    %28 = arith.addf %21, %27 : vector<16x64xf32>
    %c0_37 = arith.constant 0 : index
    %c1_38 = arith.constant 1 : index
    %c0_39 = arith.constant 0 : index
    %29 = vector.load %arg6[%c0_37, %c1_38, %c0_39] : memref<2x10x40xf32, #tpu.memory_space<vmem>>, vector<2x8x40xf32>
    %30 = vector.shape_cast %29 : vector<2x8x40xf32> to vector<16x40xf32>
    %31 = arith.truncf %30 : vector<16x40xf32> to vector<16x40xbf16>
    %c1_40 = arith.constant 1 : index
    %c0_41 = arith.constant 0 : index
    %c0_42 = arith.constant 0 : index
    %32 = vector.load %arg1[%c1_40, %c0_41, %c0_42] : memref<3x40x64xbf16, #tpu.memory_space<vmem>>, vector<1x40x64xbf16>
    %33 = vector.shape_cast %32 : vector<1x40x64xbf16> to vector<40x64xbf16>
    %cst_43 = arith.constant dense<0.000000e+00> : vector<16x64xf32>
    %34 = tpu.matmul %31, %33, %cst_43 {dimension_numbers = #tpu.dot_dimension_numbers<[1], [0], [0], [1], [0, 0, 1, 1], [], []>} : vector<16x40xbf16>, vector<40x64xbf16>, vector<16x64xf32> -> vector<16x64xf32>
    %35 = arith.addf %28, %34 : vector<16x64xf32>
    %c0_44 = arith.constant 0 : index
    %c2 = arith.constant 2 : index
    %c0_45 = arith.constant 0 : index
    %36 = vector.load %arg6[%c0_44, %c2, %c0_45] : memref<2x10x40xf32, #tpu.memory_space<vmem>>, vector<2x8x40xf32>
    %37 = vector.shape_cast %36 : vector<2x8x40xf32> to vector<16x40xf32>
    %38 = arith.truncf %37 : vector<16x40xf32> to vector<16x40xbf16>
    %c2_46 = arith.constant 2 : index
    %c0_47 = arith.constant 0 : index
    %c0_48 = arith.constant 0 : index
    %39 = vector.load %arg1[%c2_46, %c0_47, %c0_48] : memref<3x40x64xbf16, #tpu.memory_space<vmem>>, vector<1x40x64xbf16>
    %40 = vector.shape_cast %39 : vector<1x40x64xbf16> to vector<40x64xbf16>
    %cst_49 = arith.constant dense<0.000000e+00> : vector<16x64xf32>
    %41 = tpu.matmul %38, %40, %cst_49 {dimension_numbers = #tpu.dot_dimension_numbers<[1], [0], [0], [1], [0, 0, 1, 1], [], []>} : vector<16x40xbf16>, vector<40x64xbf16>, vector<16x64xf32> -> vector<16x64xf32>
    %42 = arith.addf %35, %41 : vector<16x64xf32>
    %c0_50 = arith.constant 0 : index
    %c0_51 = arith.constant 0 : index
    %43 = vector.load %arg2[%c0_50, %c0_51] : memref<1x64xf32, #tpu.memory_space<vmem>>, vector<1x64xf32>
    %44 = vector.broadcast %43 : vector<1x64xf32> to vector<16x64xf32>
    %45 = arith.addf %42, %44 : vector<16x64xf32>
    %cst_52 = arith.constant 0.000000e+00 : f32
    %46 = vector.broadcast %cst_52 : f32 to vector<2x1x80xf32>
    %c0_53 = arith.constant 0 : index
    %c0_54 = arith.constant 0 : index
    %c0_55 = arith.constant 0 : index
    %47 = vector.load %arg7[%c0_53, %c0_54, %c0_55] : memref<2x10x80xf32, #tpu.memory_space<vmem>>, vector<2x1x80xf32>
    tpu.vector_store %arg7[%c0_53, %c0_54, %c0_55], %46 {strides = array<i32>} : memref<2x10x80xf32, #tpu.memory_space<vmem>>, vector<2x1x80xf32>,
    %cst_56 = arith.constant 0.000000e+00 : f32
    %48 = vector.broadcast %cst_56 : f32 to vector<2x1x80xf32>
    %c0_57 = arith.constant 0 : index
    %c9_58 = arith.constant 9 : index
    %c0_59 = arith.constant 0 : index
    %49 = vector.load %arg7[%c0_57, %c9_58, %c0_59] : memref<2x10x80xf32, #tpu.memory_space<vmem>>, vector<2x1x80xf32>
    tpu.vector_store %arg7[%c0_57, %c9_58, %c0_59], %48 {strides = array<i32>} : memref<2x10x80xf32, #tpu.memory_space<vmem>>, vector<2x1x80xf32>,
    %cst_60 = arith.constant 0.000000e+00 : f32
    %50 = vector.broadcast %cst_60 : f32 to vector<2x10x8xf32>
    %c0_61 = arith.constant 0 : index
    %c0_62 = arith.constant 0 : index
    %c0_63 = arith.constant 0 : index
    %51 = vector.load %arg7[%c0_61, %c0_62, %c0_63] : memref<2x10x80xf32, #tpu.memory_space<vmem>>, vector<2x10x8xf32>
    tpu.vector_store %arg7[%c0_61, %c0_62, %c0_63], %50 {strides = array<i32>} : memref<2x10x80xf32, #tpu.memory_space<vmem>>, vector<2x10x8xf32>,
    %cst_64 = arith.constant 0.000000e+00 : f32
    %52 = vector.broadcast %cst_64 : f32 to vector<2x10x8xf32>
    %c0_65 = arith.constant 0 : index
    %c0_66 = arith.constant 0 : index
    %c72 = arith.constant 72 : index
    %53 = vector.load %arg7[%c0_65, %c0_66, %c72] : memref<2x10x80xf32, #tpu.memory_space<vmem>>, vector<2x10x8xf32>
    tpu.vector_store %arg7[%c0_65, %c0_66, %c72], %52 {strides = array<i32>} : memref<2x10x80xf32, #tpu.memory_space<vmem>>, vector<2x10x8xf32>,
    %54 = vector.shape_cast %45 : vector<16x64xf32> to vector<2x8x64xf32>
    %c0_67 = arith.constant 0 : index
    %c1_68 = arith.constant 1 : index
    %c8 = arith.constant 8 : index
    %55 = vector.load %arg7[%c0_67, %c1_68, %c8] : memref<2x10x80xf32, #tpu.memory_space<vmem>>, vector<2x8x64xf32>
    tpu.vector_store %arg7[%c0_67, %c1_68, %c8], %54 {strides = array<i32>} : memref<2x10x80xf32, #tpu.memory_space<vmem>>, vector<2x8x64xf32>,
    %cst_69 = arith.constant 0.000000e+00 : f32
    %56 = vector.broadcast %cst_69 : f32 to vector<16x32xf32>
    %c0_70 = arith.constant 0 : index
    %c0_71 = arith.constant 0 : index
    %c0_72 = arith.constant 0 : index
    %57 = vector.load %arg7[%c0_70, %c0_71, %c0_72] : memref<2x10x80xf32, #tpu.memory_space<vmem>>, vector<2x8x80xf32>
    %58 = vector.shape_cast %57 : vector<2x8x80xf32> to vector<16x80xf32>
    %59 = arith.truncf %58 : vector<16x80xf32> to vector<16x80xbf16>
    %c0_73 = arith.constant 0 : index
    %c0_74 = arith.constant 0 : index
    %c0_75 = arith.constant 0 : index
    %60 = vector.load %arg3[%c0_73, %c0_74, %c0_75] : memref<3x80x32xbf16, #tpu.memory_space<vmem>>, vector<1x80x32xbf16>
    %61 = vector.shape_cast %60 : vector<1x80x32xbf16> to vector<80x32xbf16>
    %cst_76 = arith.constant dense<0.000000e+00> : vector<16x32xf32>
    %62 = tpu.matmul %59, %61, %cst_76 {dimension_numbers = #tpu.dot_dimension_numbers<[1], [0], [0], [1], [0, 0, 1, 1], [], []>} : vector<16x80xbf16>, vector<80x32xbf16>, vector<16x32xf32> -> vector<16x32xf32>
    %63 = arith.addf %56, %62 : vector<16x32xf32>
    %c0_77 = arith.constant 0 : index
    %c1_78 = arith.constant 1 : index
    %c0_79 = arith.constant 0 : index
    %64 = vector.load %arg7[%c0_77, %c1_78, %c0_79] : memref<2x10x80xf32, #tpu.memory_space<vmem>>, vector<2x8x80xf32>
    %65 = vector.shape_cast %64 : vector<2x8x80xf32> to vector<16x80xf32>
    %66 = arith.truncf %65 : vector<16x80xf32> to vector<16x80xbf16>
    %c1_80 = arith.constant 1 : index
    %c0_81 = arith.constant 0 : index
    %c0_82 = arith.constant 0 : index
    %67 = vector.load %arg3[%c1_80, %c0_81, %c0_82] : memref<3x80x32xbf16, #tpu.memory_space<vmem>>, vector<1x80x32xbf16>
    %68 = vector.shape_cast %67 : vector<1x80x32xbf16> to vector<80x32xbf16>
    %cst_83 = arith.constant dense<0.000000e+00> : vector<16x32xf32>
    %69 = tpu.matmul %66, %68, %cst_83 {dimension_numbers = #tpu.dot_dimension_numbers<[1], [0], [0], [1], [0, 0, 1, 1], [], []>} : vector<16x80xbf16>, vector<80x32xbf16>, vector<16x32xf32> -> vector<16x32xf32>
    %70 = arith.addf %63, %69 : vector<16x32xf32>
    %c0_84 = arith.constant 0 : index
    %c2_85 = arith.constant 2 : index
    %c0_86 = arith.constant 0 : index
    %71 = vector.load %arg7[%c0_84, %c2_85, %c0_86] : memref<2x10x80xf32, #tpu.memory_space<vmem>>, vector<2x8x80xf32>
    %72 = vector.shape_cast %71 : vector<2x8x80xf32> to vector<16x80xf32>
    %73 = arith.truncf %72 : vector<16x80xf32> to vector<16x80xbf16>
    %c2_87 = arith.constant 2 : index
    %c0_88 = arith.constant 0 : index
    %c0_89 = arith.constant 0 : index
    %74 = vector.load %arg3[%c2_87, %c0_88, %c0_89] : memref<3x80x32xbf16, #tpu.memory_space<vmem>>, vector<1x80x32xbf16>
    %75 = vector.shape_cast %74 : vector<1x80x32xbf16> to vector<80x32xbf16>
    %cst_90 = arith.constant dense<0.000000e+00> : vector<16x32xf32>
    %76 = tpu.matmul %73, %75, %cst_90 {dimension_numbers = #tpu.dot_dimension_numbers<[1], [0], [0], [1], [0, 0, 1, 1], [], []>} : vector<16x80xbf16>, vector<80x32xbf16>, vector<16x32xf32> -> vector<16x32xf32>
    %77 = arith.addf %70, %76 : vector<16x32xf32>
    %c0_91 = arith.constant 0 : index
    %c0_92 = arith.constant 0 : index
    %78 = vector.load %arg4[%c0_91, %c0_92] : memref<1x32xf32, #tpu.memory_space<vmem>>, vector<1x32xf32>
    %79 = vector.broadcast %78 : vector<1x32xf32> to vector<16x32xf32>
    %80 = arith.addf %77, %79 : vector<16x32xf32>
    %c0_93 = arith.constant 0 : index
    %c0_94 = arith.constant 0 : index
    %81 = vector.load %arg5[%c0_93, %c0_94] : memref<16x32xf32, #tpu.memory_space<vmem>>, vector<16x32xf32>
    tpu.vector_store %arg5[%c0_93, %c0_94], %80 {strides = array<i32>} : memref<16x32xf32, #tpu.memory_space<vmem>>, vector<16x32xf32>,
    return
  }
}

</mosaic_0001>

<bundles_post_ra>
// kernel: mid_forward.1
= control target key start
LH: loop header
LB: loop body
LE: loop exit
PB: predicated region body
PF: predicated region fallthrough
CT: control target
= control target key end

     0   :  { %vm38_vm0 = vcmask 319488   ;;  %vm43_vm1 = vcmask 31744   ;;  %vm45_vm2 = vcmask 25600   ;;  %v799_v3 = vmov 0.0   ;;  %s801_s14 = smov 4   ;;  %s802_s22 = smov 8   ;;  %s1020_s0 = inlined_call_operand.vmem [shape: f32[2,2,16,32], index: 0, kind: input, shape index: {}]   ;;  %s1021_s1 = inlined_call_operand.vmem [shape: bf16[3,40,64], index: 1, kind: input, shape index: {}]   ;;  %s1022_s3 = inlined_call_operand.vmem [shape: bf16[3,80,32], index: 3, kind: input, shape index: {}]   ;;  %s1023_s2 = inlined_call_operand.vmem [shape: f32[1,64], index: 2, kind: input, shape index: {}]   ;;  %s1024_s4 = inlined_call_operand.vmem [shape: f32[1,32], index: 4, kind: input, shape index: {}]   ;;  %s1025_s5 = inlined_call_operand.vmem [shape: f32[16,32], index: 5, kind: output, shape index: {}]  }
   0x1   :  { %v21_v0 = vld [vmem:[%s1020_s0] sm:$0xff]  ;;  %v601_v1 = vld [vmem:[%s1020_s0 + $0x10] sm:$0xff]  ;;  %39 = vst.msk [vmem:[#allocation2] sm:$0x1] %vm38_vm0, %v799_v3  ;;  %41 = vst.msk [vmem:[#allocation2 + $0x9] sm:$0x1] %vm38_vm0, %v799_v3  ;;  %699 = vmatprep.subr.bf16.mxu0 %v799_v3  ;;  %709 = vmatprep.subr.bf16.mxu1 %v799_v3 }
   0x2   :  { %v603_v2 = vld [vmem:[%s1020_s0 + $0x20] sm:$0xff]  ;;  %vm49_vm3 = vcmask 326944   ;;  %vm51_vm4 = vcmask 320800   ;;  %40 = vst.msk [vmem:[#allocation2 + $0x10] sm:$0x1] %vm38_vm0, %v799_v3  ;;  %v26_v4 = vmax.f32 %v21_v0, %v601_v1  ;;  %v605_v5 = vld [vmem:[%s1020_s0 + $0x30] sm:$0xff] }
   0x3   :  { %42 = vst.msk [vmem:[#allocation2 + $0x19] sm:$0x1] %vm38_vm0, %v799_v3  ;;  %v22_v6 = vld [vmem:[%s1020_s0 + $0x8] sm:$0xff]  ;;  %v602_v7 = vld [vmem:[%s1020_s0 + $0x18] sm:$0xff]  ;;  %v34_v8 = vmax.f32 %v603_v2, %v605_v5  ;;  %vm800_vm5 = vmmov 0   ;;  %v776_v15 = vld [vmem:[%s1021_s1] sm:$0xff]  }
   0x4   :  { %44 = vst.msk [vmem:[#allocation2] sm:$0xff] %vm43_vm1, %v799_v3  ;;  %47 = vst.msk [vmem:[#allocation2 + $0x10] sm:$0xff] %vm43_vm1, %v799_v3  ;;  %v27_v9 = vmax.f32 %v22_v6, %v602_v7  ;;  %v604_v10 = vld [vmem:[%s1020_s0 + $0x28] sm:$0xff]  ;;  %v606_v11 = vld [vmem:[%s1020_s0 + $0x38] sm:$0xff]  ;;  %705 = vmatprep.mubr.msk.bf16.mxu0 %vm800_vm5, %v799_v3  ;;  %715 = vmatprep.mubr.msk.bf16.mxu1 %vm800_vm5, %v799_v3  ;;  %vm102_vm6 = vcmask 1043456   ;;  %vm63_vm7 = vcmask 293920  }
   0x5   :  { %46 = vst.msk [vmem:[#allocation2 + $0x8] sm:$0x3] %vm45_vm2, %v799_v3  ;;  %48 = vst.msk [vmem:[#allocation2 + $0x18] sm:$0x3] %vm45_vm2, %v799_v3  ;;  %v35_v12 = vmax.f32 %v604_v10, %v606_v11  ;;  %v775_v13 = vld [vmem:[%s1021_s1 + $0x14] sm:$0xff]   ;;  %v36_v14 = vmax.f32 %v26_v4, %v34_v8  ;;  %v777_v16 = vld [vmem:[%s1021_s1 + $0x1c] sm:$0xff]   ;;  %710 = vmatpush3.bf16.msra.mxu1 %v776_v15 }
   0x6   :  { %50 = vst.msk [vmem:[#allocation2] sm:$0xff] %vm49_vm3, %v799_v3  ;;  %53 = vst.msk [vmem:[#allocation2 + $0x10] sm:$0xff] %vm49_vm3, %v799_v3  ;;  %700 = vmatpush3.bf16.msra.mxu0 %v775_v13  ;;  %v778_v18 = vld [vmem:[%s1021_s1 + $0x8] sm:$0xff]   ;;  %711 = vmatprep.subr.bf16.mxu1 %v799_v3  ;;  %v779_v19 = vld [vmem:[%s1021_s1 + $0x24] ss:$0 sps:$4 sm:$0xff]   ;;  %vm98_vm8 = vcmask 326656  }
   0x7   :  { %52 = vst.msk [vmem:[#allocation2 + $0x8] sm:$0x3] %vm51_vm4, %v799_v3  ;;  %54 = vst.msk [vmem:[#allocation2 + $0x18] sm:$0x3] %vm51_vm4, %v799_v3  ;;  %57 = vrot.lane.b32.xlu0 %v36_v14, %s801_s14  ;;  %v37_v17 = vmax.f32 %v27_v9, %v35_v12  ;;  %701 = vmatprep.subr.bf16.mxu0 %v799_v3  ;;  %v780_v20 = vld [vmem:[%s1021_s1 + $0x10] ss:$0 sps:$4 sm:$0xff]  }
   0x8   :  { %v104_v21 = vsel %vm102_vm6, %v779_v19, 0  ;;  %v166_v22 = vsel %vm102_vm6, %v780_v20, 0  ;;  %v783_v23 = vld [vmem:[%s1021_s1 + $0x38] ss:$0 sps:$4 sm:$0xff]   ;;  %v781_v28 = vld [vmem:[%s1021_s1 + $0x28] sm:$0xff]   ;;  %v782_v34 = vld [vmem:[%s1021_s1 + $0x30] sm:$0xff]  }
   0x9   :  { %712 = vmatpush3.bf16.msra.mxu1 %v778_v18  ;;  %v237_v24 = vsel %vm102_vm6, %v783_v23, 0  ;;  %vm291_vm9 = vcmask 647168   ;;  %vm296_vm10 = vcmask 64512   ;;  %vm298_vm11 = vcmask 58368   ;;  %v784_v38 = vld [vmem:[%s1022_s3 + $0x28] sm:$0xff]   ;;  %v785_v39 = vld [vmem:[%s1022_s3] sm:$0xff]  }
   0xa   :  { %702 = vmatpush3.bf16.msra.mxu0 %v777_v16  ;;  %713 = vmatprep.subr.bf16.mxu1 %v799_v3  ;;  %vm302_vm12 = vcmask 654912   ;;  %292 = vst.msk [vmem:[#allocation3] sm:$0x1] %vm291_vm9, %v799_v3  ;;  %294 = vst.msk [vmem:[#allocation3 + $0x9] sm:$0x1] %vm291_vm9, %v799_v3  ;;  %vm304_vm13 = vcmask 648768  }
   0xb   :  { %59 = vrot.lane.b32.xlu0 %v37_v17, %s801_s14  ;;  %703 = vmatprep.subr.bf16.mxu0 %v799_v3  ;;  %293 = vst.msk [vmem:[#allocation3 + $0x10] sm:$0x1] %vm291_vm9, %v799_v3  ;;  %295 = vst.msk [vmem:[#allocation3 + $0x19] sm:$0x1] %vm291_vm9, %v799_v3  ;;  %v786_v40 = vld [vmem:[%s1022_s3 + $0x30] sm:$0xff]   ;;  %v787_v41 = vld [vmem:[%s1022_s3 + $0x8] sm:$0xff]  }
   0xc   :  { %297 = vst.msk [vmem:[#allocation3] sm:$0xff] %vm296_vm10, %v799_v3  ;;  %300 = vst.msk [vmem:[#allocation3 + $0x10] sm:$0xff] %vm296_vm10, %v799_v3  ;;  %v788_v52 = vld [vmem:[%s1022_s3 + $0x38] sm:$0xff]   ;;  %v789_v53 = vld [vmem:[%s1022_s3 + $0x10] sm:$0xff]   ;;  %vm316_vm14 = vcmask 588864   ;;  %vm376_vm15 = vcmask 654336  }
   0xd   :  { %714 = vmatpush3.bf16.msra.mxu1 %v166_v22  ;;  %299 = vst.msk [vmem:[#allocation3 + $0x8] sm:$0x3] %vm298_vm11, %v799_v3  ;;  %301 = vst.msk [vmem:[#allocation3 + $0x18] sm:$0x3] %vm298_vm11, %v799_v3  ;;  %v790_v54 = vld [vmem:[%s1022_s3 + $0x40] sm:$0xff]   ;;  %v791_v55 = vld [vmem:[%s1022_s3 + $0x18] sm:$0xff]  }
   0xe   :  { %704 = vmatpush3.bf16.msra.mxu0 %v104_v21  ;;  %729 = vmatprep.subr.bf16.mxu1 %v799_v3  ;;  %303 = vst.msk [vmem:[#allocation3] sm:$0xff] %vm302_vm12, %v799_v3  ;;  %306 = vst.msk [vmem:[#allocation3 + $0x10] sm:$0xff] %vm302_vm12, %v799_v3  ;;  %v792_v56 = vld [vmem:[%s1022_s3 + $0x48] sm:$0xff]   ;;  %v793_v57 = vld [vmem:[%s1022_s3 + $0x20] sm:$0xff]   ;;  %vm594_vm0 = vcmask 261120  }
   0xf   :  { %719 = vmatprep.subr.bf16.mxu0 %v799_v3  ;;  %305 = vst.msk [vmem:[#allocation3 + $0x8] sm:$0x3] %vm304_vm13, %v799_v3  ;;  %307 = vst.msk [vmem:[#allocation3 + $0x18] sm:$0x3] %vm304_vm13, %v799_v3  ;;  %v629_v59 = vld [vmem:[%s1023_s2] ss:$0 sm:$0xff] }
  0x10   :  { %v794_v7 = vld [vmem:[%s1022_s3 + $0x50] sm:$0xff]   ;;  %v795_v13 = vld [vmem:[%s1022_s3 + $0x58] sm:$0xff]   ;;  %v796_v14 = vld [vmem:[%s1022_s3 + $0x60] sm:$0xff]  }
  0x11   :  { %v797_v15 = vld [vmem:[%s1022_s3 + $0x68] sm:$0xff]   ;;  %v798_v16 = vld [vmem:[%s1022_s3 + $0x70] sm:$0xff]  }
  0x79   :  { %v58_v25 = vpop.permute.xlu0 %57 }
  0x7a   :  { %64 = vst.msk [vmem:[#allocation2 + $0x1] sm:$0xff] %vm63_vm7, %v58_v25 }
  0x7d   :  { %v60_v26 = vpop.permute.xlu0 %59 }
  0x7e   :  { %65 = vst.msk [vmem:[#allocation2 + $0x11] sm:$0xff] %vm63_vm7, %v60_v26 }
  0x81   :  { %v74_v27 = vld [vmem:[#allocation2 + $0x1] sm:$0xff] }
  0x82   :  { %v66_v30 = vld [vmem:[#allocation2] sm:$0xff] }
  0x83   :  { %v209_v36 = vld [vmem:[#allocation2 + $0x2] sm:$0xff] }
  0x85   :  { %v75_v29 = vld [vmem:[#allocation2 + $0x11] sm:$0xff] }
  0x86   :  { %v67_v31 = vld [vmem:[#allocation2 + $0x10] sm:$0xff]  ;;  %v76_v32 = vpack.c.bf16 %v75_v29, %v74_v27 }
  0x87   :  { %v68_v33 = vpack.c.bf16 %v67_v31, %v66_v30  ;;  %v210_v35 = vld [vmem:[#allocation2 + $0x12] sm:$0xff] }
  0x88   :  { %706 = vmatmul.mubr.msk.bf16.vlgmr.msra.gmra.mrb[0].mxu0 %vm98_vm8, %v76_v32  ;;  %v211_v37 = vpack.c.bf16 %v210_v35, %v209_v36 }
  0x89   :  { %716 = vmatmul.mubr.msk.bf16.vlgmr.msra.gmra.mrb[0].mxu1 %vm98_vm8, %v68_v33  ;;  %720 = vmatpush3.bf16.msra.mxu0 %v781_v28 }
  0x8a   :  { %725 = vmatprep.mubr.msk.bf16.mxu0 %vm800_vm5, %v799_v3  ;;  %721 = vmatprep.subr.bf16.mxu0 %v799_v3 }
  0x8b   :  { %739 = vmatprep.mubr.msk.bf16.mxu1 %vm800_vm5, %v799_v3  ;;  %730 = vmatpush3.bf16.msra.mxu1 %v784_v38 }
  0x8c   :  { %731 = vmatprep.subr.bf16.mxu1 %v799_v3 }
  0x8d   :  { %722 = vmatpush3.bf16.msra.mxu0 %v782_v34 }
  0x8e   :  { %723 = vmatprep.subr.bf16.mxu0 %v799_v3 }
  0x8f   :  { %732 = vmatpush3.bf16.msra.mxu1 %v786_v40 }
  0x90   :  { %733 = vmatprep.subr.bf16.mxu1 %v799_v3 }
  0x91   :  { %724 = vmatpush3.bf16.msra.mxu0 %v237_v24 }
  0x92   :  { %743 = vmatprep.subr.bf16.mxu0 %v799_v3 }
  0x93   :  { %734 = vmatpush3.bf16.msra.mxu1 %v788_v52 }
  0x94   :  { %726 = vmatmul.mubr.msk.bf16.vlgmr.msra.gmra.mrb[4].mxu0 %vm98_vm8, %v211_v37  ;;  %735 = vmatprep.subr.bf16.mxu1 %v799_v3 }
  0x95   :  { %753 = vmatprep.mubr.msk.bf16.mxu0 %vm800_vm5, %v799_v3  ;;  %744 = vmatpush3.bf16.msra.mxu0 %v785_v39 }
  0x96   :  { %745 = vmatprep.subr.bf16.mxu0 %v799_v3 }
  0x97   :  { %736 = vmatpush3.bf16.msra.mxu1 %v790_v54 }
  0x98   :  { %737 = vmatprep.subr.bf16.mxu1 %v799_v3 }
  0x99   :  { %746 = vmatpush3.bf16.msra.mxu0 %v787_v41 }
  0x9a   :  { %747 = vmatprep.subr.bf16.mxu0 %v799_v3 }
  0x9b   :  { %738 = vmatpush3.bf16.msra.mxu1 %v792_v56 }
  0x9c   :  { %757 = vmatprep.subr.bf16.mxu1 %v799_v3 }
  0x9d   :  { %748 = vmatpush3.bf16.msra.mxu0 %v789_v53 }
  0x9e   :  { %749 = vmatprep.subr.bf16.mxu0 %v799_v3 }
  0xa1   :  { %750 = vmatpush3.bf16.msra.mxu0 %v791_v55 }
  0xa2   :  { %751 = vmatprep.subr.bf16.mxu0 %v799_v3 }
  0xa5   :  { %752 = vmatpush3.bf16.msra.mxu0 %v793_v57 }
 0x15b   :  { %v140_v42 = vpop.f32.mrb[0].mxu0 }
 0x15c   :  { %v202_v43 = vpop.f32.mrb[0].mxu1  ;;  %v707_v45 = vpop.f32.mrb[1].mxu0 }
 0x15d   :  { %v203_v44 = vadd.f32 %v202_v43, %v140_v42  ;;  %v717_v46 = vpop.f32.mrb[1].mxu1  ;;  %v143_v47 = vpop.f32.mrb[2].mxu0 }
 0x15e   :  { %v205_v48 = vpop.f32.mrb[2].mxu1  ;;  %v708_v50 = vpop.f32.mrb[3].mxu0 }
 0x15f   :  { %v206_v49 = vadd.f32 %v205_v48, %v143_v47  ;;  %v718_v51 = vpop.f32.mrb[3].mxu1 }
 0x167   :  { %v273_v58 = vpop.f32.mrb[4].mxu0 }
 0x168   :  { %v280_v60 = vadd.f32 %v273_v58, %v203_v44  ;;  %v727_v61 = vpop.f32.mrb[5].mxu0 }
 0x169   :  { %v276_v62 = vpop.f32.mrb[6].mxu0 }
 0x16a   :  { %v281_v63 = vadd.f32 %v276_v62, %v206_v49  ;;  %v728_v0 = vpop.f32.mrb[7].mxu0  ;;  %v289_v1 = vadd.f32 %v629_v59, %v280_v60 }
 0x16c   :  { %310 = vrot.lane.b32.xlu1 %v289_v1, %s802_s22  ;;  %v290_v2 = vadd.f32 %v629_v59, %v281_v63 }
 0x170   :  { %312 = vrot.lane.b32.xlu1 %v290_v2, %s802_s22 }
 0x1de   :  { %v311_v4 = vpop.permute.xlu1 %310 }
 0x1df   :  { %317 = vst.msk [vmem:[#allocation3 + $0x1] sm:$0xff] %vm316_vm14, %v311_v4 }
 0x1e2   :  { %v313_v5 = vpop.permute.xlu1 %312 }
 0x1e3   :  { %318 = vst.msk [vmem:[#allocation3 + $0x11] sm:$0xff] %vm316_vm14, %v313_v5 }
 0x1e6   :  { %v332_v6 = vld [vmem:[#allocation3 + $0x1] sm:$0xff] }
 0x1e7   :  { %v319_v9 = vld [vmem:[#allocation3] sm:$0xff] }
 0x1e8   :  { %v495_v18 = vld [vmem:[#allocation3 + $0x2] sm:$0xff] }
 0x1ea   :  { %v333_v8 = vld [vmem:[#allocation3 + $0x11] sm:$0xff] }
 0x1eb   :  { %v320_v10 = vld [vmem:[#allocation3 + $0x10] sm:$0xff]  ;;  %v334_v11 = vpack.c.bf16 %v333_v8, %v332_v6 }
 0x1ec   :  { %v321_v12 = vpack.c.bf16 %v320_v10, %v319_v9  ;;  %v496_v17 = vld [vmem:[#allocation3 + $0x12] sm:$0xff] }
 0x1ed   :  { %740 = vmatmul.mubr.msk.bf16.vlgmr.msra.gmra.mrb[4].mxu1 %vm376_vm15, %v334_v11  ;;  %v497_v19 = vpack.c.bf16 %v496_v17, %v495_v18 }
 0x1ee   :  { %754 = vmatmul.mubr.msk.bf16.vlgmr.msra.gmra.mrb[8].mxu0 %vm376_vm15, %v321_v12  ;;  %758 = vmatpush3.bf16.msra.mxu1 %v794_v7 }
 0x1ef   :  { %767 = vmatprep.mubr.msk.bf16.mxu1 %vm800_vm5, %v799_v3  ;;  %759 = vmatprep.subr.bf16.mxu1 %v799_v3 }
 0x1f2   :  { %760 = vmatpush3.bf16.msra.mxu1 %v795_v13 }
 0x1f3   :  { %761 = vmatprep.subr.bf16.mxu1 %v799_v3 }
 0x1f6   :  { %762 = vmatpush3.bf16.msra.mxu1 %v796_v14 }
 0x1f7   :  { %763 = vmatprep.subr.bf16.mxu1 %v799_v3 }
 0x1fa   :  { %764 = vmatpush3.bf16.msra.mxu1 %v797_v15 }
 0x1fb   :  { %765 = vmatprep.subr.bf16.mxu1 %v799_v3  ;;  %v668_v3 = vld [vmem:[%s1024_s4] ss:$0 sm:$0xff] }
 0x1fe   :  { %766 = vmatpush3.bf16.msra.mxu1 %v798_v16 }
 0x201   :  { %768 = vmatmul.mubr.msk.bf16.vlgmr.msra.gmra.mrb[8].mxu1 %vm376_vm15, %v497_v19 }
 0x2c0   :  { %v414_v20 = vpop.f32.mrb[4].mxu1 }
 0x2c1   :  { %v488_v21 = vpop.f32.mrb[8].mxu0  ;;  %v741_v23 = vpop.f32.mrb[5].mxu1 }
 0x2c2   :  { %v489_v22 = vadd.f32 %v488_v21, %v414_v20  ;;  %v755_v24 = vpop.f32.mrb[9].mxu0  ;;  %v417_v25 = vpop.f32.mrb[6].mxu1 }
 0x2c3   :  { %v491_v26 = vpop.f32.mrb[10].mxu0  ;;  %v742_v28 = vpop.f32.mrb[7].mxu1 }
 0x2c4   :  { %v492_v27 = vadd.f32 %v491_v26, %v417_v25  ;;  %v756_v29 = vpop.f32.mrb[11].mxu0 }
 0x2d4   :  { %v576_v30 = vpop.f32.mrb[8].mxu1 }
 0x2d5   :  { %v583_v31 = vadd.f32 %v576_v30, %v489_v22  ;;  %v769_v32 = vpop.f32.mrb[9].mxu1 }
 0x2d6   :  { %v579_v33 = vpop.f32.mrb[10].mxu1 }
 0x2d7   :  { %v592_v34 = vadd.f32 %v668_v3, %v583_v31  ;;  %v584_v35 = vadd.f32 %v579_v33, %v492_v27  ;;  %v770_v36 = vpop.f32.mrb[11].mxu1 }
 0x2d9   :  { %595 = vst.msk [vmem:[%s1025_s5] sm:$0xff] %vm594_vm0, %v592_v34  ;;  %v593_v37 = vadd.f32 %v668_v3, %v584_v35 }
 0x2db   :  { %596 = vst.msk [vmem:[%s1025_s5 + $0x8] sm:$0xff] %vm594_vm0, %v593_v37 }

</bundles_post_ra>
